<compile_context>
chip_gen: v7x
topology: tpu7x:2x2x1
jax: 0.10.0
libtpu: 0.0.40
codegen_flags: <defaults>
</compile_context>

<pallas_src>
import jax
import jax.numpy as jnp
from jax.experimental import pallas as pl
from jax.experimental.pallas import tpu as pltpu


def _head_kernel(slow_ref, fast_ref, ws_ref, wf_ref, b_ref, out_ref):
    # s{0,1}_avg_pool: AvgPool3d over the full (T, H, W) extent, stride=1
    # == a single mean per (sample, channel).
    inv0 = 1.0 / slow_ref.shape[-1]
    inv1 = 1.0 / fast_ref.shape[-1]
    slow_mean = jnp.sum(slow_ref[...], axis=-1) * inv0          # (NB, C0)
    fast_mean = jnp.sum(fast_ref[...], axis=-1) * inv1          # (NB, C1)

    # cat([slow, fast], 1) @ W.T + b == slow @ W[:, :C0].T + fast @ W[:, C0:].T + b
    logits = (jnp.dot(slow_mean, ws_ref[...], preferred_element_type=jnp.float32)
              + jnp.dot(fast_mean, wf_ref[...], preferred_element_type=jnp.float32)
              + b_ref[...])                                     # (NB, NC)

    # rt_act: Softmax(dim=-1).  rt_dropout is identity in eval mode.
    m = jnp.max(logits, axis=-1, keepdims=True)
    e = jnp.exp(logits - m)
    out_ref[...] = (e / jnp.sum(e, axis=-1, keepdims=True)).astype(out_ref.dtype)


def head_fullframe_sf_forward(feats_slow, feats_fast, proj_w, proj_b, boxes=None):
    """Forward pass of Head_fullframe_sf_8x8 (eval mode).

    feats_slow: (N, C0, T0, H, W) float32  -- slow pathway features
    feats_fast: (N, C1, T1, H, W) float32  -- fast pathway features
    proj_w:     (num_classes, C0 + C1)     -- rt_projection.weight (PyTorch layout)
    proj_b:     (num_classes,)             -- rt_projection.bias
    boxes: unused (kept for interface parity with the PyTorch module).
    """
    del boxes  # the module's forward never uses it
    N, C0, T0, H, W = feats_slow.shape
    Nf, C1, T1, Hf, Wf = feats_fast.shape
    assert Nf == N and Hf == H and Wf == W
    NC, Csum = proj_w.shape
    assert Csum == C0 + C1

    THW0 = T0 * H * W
    THW1 = T1 * H * W
    slow = feats_slow.reshape(N, C0, THW0)        # free contiguous reshape
    fast = feats_fast.reshape(N, C1, THW1)
    w_slow = jnp.transpose(proj_w[:, :C0])        # (C0, NC)
    w_fast = jnp.transpose(proj_w[:, C0:])        # (C1, NC)
    bias = proj_b.reshape(1, NC)

    # Batch-block size: as many samples per grid step as a modest VMEM budget
    # allows (x2 for double buffering), so per-step overhead is amortized.
    itemsize = jnp.dtype(feats_slow.dtype).itemsize
    per_sample_bytes = (C0 * THW0 + C1 * THW1) * itemsize
    budget_bytes = 8 * 1024 * 1024
    nb = 1
    for cand in range(1, min(N, 16) + 1):
        if N % cand == 0 and 2 * cand * per_sample_bytes <= budget_bytes:
            nb = cand
    grid = (N // nb,)

    grid_spec = pltpu.PrefetchScalarGridSpec(
        num_scalar_prefetch=0,
        grid=grid,
        in_specs=[
            pl.BlockSpec((nb, C0, THW0), lambda b: (b, 0, 0)),   # slow features
            pl.BlockSpec((nb, C1, THW1), lambda b: (b, 0, 0)),   # fast features
            pl.BlockSpec((C0, NC), lambda b: (0, 0)),            # W[:, :C0].T (resident)
            pl.BlockSpec((C1, NC), lambda b: (0, 0)),            # W[:, C0:].T (resident)
            pl.BlockSpec((1, NC), lambda b: (0, 0)),             # bias (resident)
        ],
        out_specs=pl.BlockSpec((nb, NC), lambda b: (b, 0)),
    )

    out = pl.pallas_call(
        _head_kernel,
        out_shape=jax.ShapeDtypeStruct((N, NC), jnp.float32),
        grid_spec=grid_spec,
        compiler_params=pltpu.CompilerParams(
            dimension_semantics=("parallel",)),   # batch blocks are independent
    )(slow, fast, w_slow, w_fast, bias)

    # debug_outputs=False path of the module returns only x_final.
    return {"x_final": out}


if __name__ == "__main__":
    key = jax.random.PRNGKey(0)
    # Small shapes consistent with the module's config arithmetic:
    #   WIDTH_PER_GROUP=4, BETA_INV=8  -> dim_in = [128, 16]
    #   NUM_FRAMES=16, ALPHA=4, POOL1=[[1,1,1],[1,1,1]], CROP_SIZE=256
    #   -> slow T=4, fast T=16, H=W=256//32=8, pool_size == full feature extent.
    N = 2
    C_SLOW = 4 * 32                 # 128
    C_FAST = 4 * 32 // 8            # 16
    T_SLOW, T_FAST = 4, 16
    H = W = 8
    NUM_CLASSES = 16

    k1, k2, k3, k4 = jax.random.split(key, 4)
    feats_slow = jax.random.normal(k1, (N, C_SLOW, T_SLOW, H, W), dtype=jnp.float32)
    feats_fast = jax.random.normal(k2, (N, C_FAST, T_FAST, H, W), dtype=jnp.float32)
    dim_in = C_SLOW + C_FAST
    bound = 1.0 / (dim_in ** 0.5)   # PyTorch nn.Linear default init range
    proj_w = jax.random.uniform(k3, (NUM_CLASSES, dim_in), jnp.float32, -bound, bound)
    proj_b = jax.random.uniform(k4, (NUM_CLASSES,), jnp.float32, -bound, bound)
    boxes = jnp.zeros((3, 5), dtype=jnp.float32)   # unused by the module

    result = head_fullframe_sf_forward(feats_slow, feats_fast, proj_w, proj_b, boxes)
    x_final = jax.block_until_ready(result["x_final"])

    # Plain-JAX reference of the module's forward (eval mode).
    ref_slow = jnp.mean(feats_slow, axis=(2, 3, 4))
    ref_fast = jnp.mean(feats_fast, axis=(2, 3, 4))
    ref_x = jnp.concatenate([ref_slow, ref_fast], axis=1)
    ref_logits = ref_x @ proj_w.T + proj_b
    ref = jax.nn.softmax(ref_logits, axis=-1)
    assert x_final.shape == (N, NUM_CLASSES)
    assert jnp.allclose(x_final, ref, rtol=1e-4, atol=1e-5), "mismatch vs reference"
    print("KERNEL_OK")
</pallas_src>

<mosaic_0001>
module attributes {stable_mosaic.version = 11 : i64} {
  func.func @_head_kernel(%arg0: i32, %arg1: memref<2x128x256xf32, #tpu.memory_space<vmem>>, %arg2: memref<2x16x1024xf32, #tpu.memory_space<vmem>>, %arg3: memref<128x16xf32, #tpu.memory_space<vmem>>, %arg4: memref<16x16xf32, #tpu.memory_space<vmem>>, %arg5: memref<1x16xf32, #tpu.memory_space<vmem>>, %arg6: memref<2x16xf32, #tpu.memory_space<vmem>>) attributes {dimension_semantics = [#tpu.dimension_semantics<parallel>], iteration_bounds = array<i64: 1>, scalar_prefetch = 0 : i64, scratch_operands = 0 : i64, tpu.core_type = #tpu.core_type<tc>, window_params = [{transform_indices = @transform_0, window_bounds = array<i64: 2, 128, 256>}, {transform_indices = @transform_1, window_bounds = array<i64: 2, 16, 1024>}, {pipeline_mode = #tpu.pipeline_mode<synchronous>, transform_indices = @transform_2, window_bounds = array<i64: 128, 16>}, {pipeline_mode = #tpu.pipeline_mode<synchronous>, transform_indices = @transform_3, window_bounds = array<i64: 16, 16>}, {pipeline_mode = #tpu.pipeline_mode<synchronous>, transform_indices = @transform_4, window_bounds = array<i64: 1, 16>}, {transform_indices = @transform_5, window_bounds = array<i64: 2, 16>}]} {
    %c0 = arith.constant 0 : index
    %c0_0 = arith.constant 0 : index
    %c0_1 = arith.constant 0 : index
    %0 = vector.load %arg1[%c0, %c0_0, %c0_1] : memref<2x128x256xf32, #tpu.memory_space<vmem>>, vector<2x128x256xf32>
    %cst = arith.constant dense<0.000000e+00> : vector<2x128xf32>
    %1 = vector.multi_reduction <add>, %0, %cst [2] : vector<2x128x256xf32> to vector<2x128xf32>
    %cst_2 = arith.constant 3.906250e-03 : f32
    %2 = vector.broadcast %cst_2 : f32 to vector<2x128xf32>
    %3 = arith.mulf %1, %2 : vector<2x128xf32>
    %c0_3 = arith.constant 0 : index
    %c0_4 = arith.constant 0 : index
    %c0_5 = arith.constant 0 : index
    %4 = vector.load %arg2[%c0_3, %c0_4, %c0_5] : memref<2x16x1024xf32, #tpu.memory_space<vmem>>, vector<2x16x1024xf32>
    %cst_6 = arith.constant dense<0.000000e+00> : vector<2x16xf32>
    %5 = vector.multi_reduction <add>, %4, %cst_6 [2] : vector<2x16x1024xf32> to vector<2x16xf32>
    %cst_7 = arith.constant 9.765625E-4 : f32
    %6 = vector.broadcast %cst_7 : f32 to vector<2x16xf32>
    %7 = arith.mulf %5, %6 : vector<2x16xf32>
    %c0_8 = arith.constant 0 : index
    %c0_9 = arith.constant 0 : index
    %8 = vector.load %arg3[%c0_8, %c0_9] : memref<128x16xf32, #tpu.memory_space<vmem>>, vector<128x16xf32>
    %cst_10 = arith.constant dense<0.000000e+00> : vector<2x16xf32>
    %9 = tpu.matmul %3, %8, %cst_10 {dimension_numbers = #tpu.dot_dimension_numbers<[1], [0], [0], [1], [0, 0, 1, 1], [], []>} : vector<2x128xf32>, vector<128x16xf32>, vector<2x16xf32> -> vector<2x16xf32>
    %c0_11 = arith.constant 0 : index
    %c0_12 = arith.constant 0 : index
    %10 = vector.load %arg4[%c0_11, %c0_12] : memref<16x16xf32, #tpu.memory_space<vmem>>, vector<16x16xf32>
    %cst_13 = arith.constant dense<0.000000e+00> : vector<2x16xf32>
    %11 = tpu.matmul %7, %10, %cst_13 {dimension_numbers = #tpu.dot_dimension_numbers<[1], [0], [0], [1], [0, 0, 1, 1], [], []>} : vector<2x16xf32>, vector<16x16xf32>, vector<2x16xf32> -> vector<2x16xf32>
    %12 = arith.addf %9, %11 : vector<2x16xf32>
    %c0_14 = arith.constant 0 : index
    %c0_15 = arith.constant 0 : index
    %13 = vector.load %arg5[%c0_14, %c0_15] : memref<1x16xf32, #tpu.memory_space<vmem>>, vector<1x16xf32>
    %14 = vector.broadcast %13 : vector<1x16xf32> to vector<2x16xf32>
    %15 = arith.addf %12, %14 : vector<2x16xf32>
    %cst_16 = arith.constant dense<0xFF800000> : vector<2xf32>
    %16 = vector.multi_reduction <maximumf>, %15, %cst_16 [1] : vector<2x16xf32> to vector<2xf32>
    %17 = vector.shape_cast %16 : vector<2xf32> to vector<2x1xf32>
    %18 = vector.broadcast %17 : vector<2x1xf32> to vector<2x16xf32>
    %19 = arith.subf %15, %18 : vector<2x16xf32>
    %20 = math.exp %19 : vector<2x16xf32>
    %cst_17 = arith.constant dense<0.000000e+00> : vector<2xf32>
    %21 = vector.multi_reduction <add>, %20, %cst_17 [1] : vector<2x16xf32> to vector<2xf32>
    %22 = vector.shape_cast %21 : vector<2xf32> to vector<2x1xf32>
    %23 = vector.broadcast %22 : vector<2x1xf32> to vector<2x16xf32>
    %24 = arith.divf %20, %23 : vector<2x16xf32>
    %c0_18 = arith.constant 0 : index
    %c0_19 = arith.constant 0 : index
    %25 = vector.load %arg6[%c0_18, %c0_19] : memref<2x16xf32, #tpu.memory_space<vmem>>, vector<2x16xf32>
    tpu.vector_store %arg6[%c0_18, %c0_19], %24 {strides = array<i32>} : memref<2x16xf32, #tpu.memory_space<vmem>>, vector<2x16xf32>,
    return
  }
  func.func @transform_0(%arg0: i32) -> (i32, i32, i32) {
    %c0_i32 = arith.constant 0 : i32
    %c0_i32_0 = arith.constant 0 : i32
    %c0_i32_1 = arith.constant 0 : i32
    return %arg0, %c0_i32, %c0_i32_0 : i32, i32, i32
  }
  func.func @transform_1(%arg0: i32) -> (i32, i32, i32) {
    %c0_i32 = arith.constant 0 : i32
    %c0_i32_0 = arith.constant 0 : i32
    %c0_i32_1 = arith.constant 0 : i32
    return %arg0, %c0_i32, %c0_i32_0 : i32, i32, i32
  }
  func.func @transform_2(%arg0: i32) -> (i32, i32) {
    %c0_i32 = arith.constant 0 : i32
    %c0_i32_0 = arith.constant 0 : i32
    %c0_i32_1 = arith.constant 0 : i32
    return %c0_i32, %c0_i32_0 : i32, i32
  }
  func.func @transform_3(%arg0: i32) -> (i32, i32) {
    %c0_i32 = arith.constant 0 : i32
    %c0_i32_0 = arith.constant 0 : i32
    %c0_i32_1 = arith.constant 0 : i32
    return %c0_i32, %c0_i32_0 : i32, i32
  }
  func.func @transform_4(%arg0: i32) -> (i32, i32) {
    %c0_i32 = arith.constant 0 : i32
    %c0_i32_0 = arith.constant 0 : i32
    %c0_i32_1 = arith.constant 0 : i32
    return %c0_i32, %c0_i32_0 : i32, i32
  }
  func.func @transform_5(%arg0: i32) -> (i32, i32) {
    %c0_i32 = arith.constant 0 : i32
    %c0_i32_0 = arith.constant 0 : i32
    return %arg0, %c0_i32 : i32, i32
  }
}

</mosaic_0001>

<bundles_post_ra>
// kernel: tpu_custom_call.1
= control target key start
LH: loop header
LB: loop body
LE: loop exit
PB: predicated region body
PF: predicated region fallthrough
CT: control target
= control target key end

     0   :  { %10 = vsyncpa [#allocation3], 0  ;;  %s1226_s0 = inlined_call_operand.hbm [shape: f32[2,128,256], index: 0, kind: input, shape index: {}]   ;;  %s1227_s1 = inlined_call_operand.hbm [shape: f32[2,16,1024], index: 1, kind: input, shape index: {}]   ;;  %s1228_s2 = inlined_call_operand.vmem [shape: f32[128,16], index: 2, kind: input, shape index: {}]   ;;  %s1229_s3 = inlined_call_operand.vmem [shape: f32[16,16], index: 3, kind: input, shape index: {}]   ;;  %s1230_s4 = inlined_call_operand.vmem [shape: f32[1,16], index: 4, kind: input, shape index: {}]   ;;  %s1231_s5 = inlined_call_operand.hbm [shape: f32[2,16], index: 5, kind: output, shape index: {}]  }
   0x1   :  { %11 = vsyncpa [#allocation6], 0 }
   0x2   :  { %12 = vsyncpa [#allocation4], 0  ;;  %s936_s18 = smov [#allocation2]   ;;  %s864_s22 = scalar_lea.hbm %s1226_s0, 8192 }
   0x3   :  { %s18_s19 = sshll.u32 %s936_s18, 4  ;;  %p865_p0 = scmp.ne.s32.totalorder %s1226_s0, %s864_s22  ;;  %s19_s19 = int_to_ptr.vmem [resolvable:$true] %s18_s19 }
   0x4   :  { %p868_p1 = scmp.lt.u32.totalorder %s864_s22, %s1226_s0 }
   0x6   :  { %p870_p2 = pnand %p868_p1, %p865_p0 }
   0x8   :  { %873 = shalt.err (!%p870_p2)
}
   0x9   :  { %s874_s27 = scalar_lea.vmem %s19_s19, 8192  ;;  %p879_p4 = scmp.lt.s32.totalorder %s19_s19, %s19_s19 }
   0xa   :  { %p875_p3 = scmp.ne.s32.totalorder %s19_s19, %s874_s27  ;;  %p880_p5 = scmp.lt.s32.totalorder %s874_s27, %s874_s27 }
   0xc   :  { %p881_p6 = por %p880_p5, %p879_p4 }
   0xe   :  { %p882_p7 = pnand %p881_p6, %p875_p3 }
  0x10   :  { %885 = shalt.err (!%p882_p7)
}
  0x11   :  { %s937_s28 = smov 256   ;;  %s938_s29 = smov 16  }
  0x12   :  { %24 = dma.hbm_to_vmem [thread:$0]  %s1226_s0, 8192, %s19_s19, [#allocation3], %s937_s28, %s937_s28, %s938_s29  }
  0x13   :  { %s939_s7 = smov [#allocation5]   ;;  %s886_s11 = scalar_lea.hbm %s1227_s1, 4096 }
  0x14   :  { %s30_s8 = sshll.u32 %s939_s7, 4  ;;  %p887_p8 = scmp.ne.s32.totalorder %s1227_s1, %s886_s11  ;;  %s31_s8 = int_to_ptr.vmem [resolvable:$true] %s30_s8 }
  0x15   :  { %p890_p9 = scmp.lt.u32.totalorder %s886_s11, %s1227_s1 }
  0x17   :  { %p892_p10 = pnand %p890_p9, %p887_p8 }
  0x19   :  { %895 = shalt.err (!%p892_p10)
}
  0x1a   :  { %s896_s16 = scalar_lea.vmem %s31_s8, 4096  ;;  %p901_p12 = scmp.lt.s32.totalorder %s31_s8, %s31_s8 }
  0x1b   :  { %p897_p11 = scmp.ne.s32.totalorder %s31_s8, %s896_s16  ;;  %p902_p13 = scmp.lt.s32.totalorder %s896_s16, %s896_s16 }
  0x1d   :  { %p903_p0 = por %p902_p13, %p901_p12 }
  0x1f   :  { %p904_p1 = pnand %p903_p0, %p897_p11 }
  0x21   :  { %907 = shalt.err (!%p904_p1)
}
  0x22   :  { %s940_s0 = smov 1024   ;;  %s941_s17 = smov 64  }
  0x23   :  { %36 = dma.hbm_to_vmem [thread:$0]  %s1227_s1, 4096, %s31_s8, [#allocation6], %s940_s0, %s940_s0, %s941_s17  }
  0x24   :  { %930 = dma.done.wait [#allocation3], 8192  }
  0x25   :  { %931 = vsyncadd [#allocation3], 4294959104 }
  0x26   :  { %932 = dma.done.wait [#allocation6], 4096  }
  0x27   :  { %933 = vsyncadd [#allocation6], 4294963200  ;;  %v81_v0 = vld [vmem:[#allocation2 + $0x100] sm:$0xff]  ;;  %v82_v1 = vld [vmem:[#allocation2 + $0x108] sm:$0xff]  ;;  %vm943_vm0 = vmmov 0   ;;  %vm346_vm1 = vcmask 130112  }
  0x28   :  { %v49_v2 = vld [vmem:[#allocation2] sm:$0xff]  ;;  %v161_v3 = vadd.f32 %v82_v1, %v81_v0  ;;  %v50_v4 = vld [vmem:[#allocation2 + $0x8] sm:$0xff]  ;;  %v83_v5 = vld [vmem:[#allocation2 + $0x110] sm:$0xff]  ;;  %vm478_vm2 = vcmask 195712   ;;  %vm485_vm3 = vcmask 261312   ;;  %vm492_vm4 = vcmask 326912  }
  0x29   :  { %v84_v6 = vld [vmem:[#allocation2 + $0x118] sm:$0xff]  ;;  %v113_v7 = vadd.f32 %v50_v4, %v49_v2  ;;  %v51_v8 = vld [vmem:[#allocation2 + $0x10] sm:$0xff]  ;;  %v85_v12 = vld [vmem:[#allocation2 + $0x120] sm:$0xff]  ;;  %vm499_vm5 = vcmask 392512   ;;  %vm506_vm6 = vcmask 458112   ;;  %vm513_vm7 = vcmask 523712  }
  0x2a   :  { %v52_v9 = vld [vmem:[#allocation2 + $0x18] sm:$0xff]  ;;  %162 = vadd.xlane.f32.xlu1 %v161_v3  ;;  %v164_v10 = vadd.f32 %v84_v6, %v83_v5  ;;  %v86_v13 = vld [vmem:[#allocation2 + $0x128] sm:$0xff]  ;;  %v53_v14 = vld [vmem:[#allocation2 + $0x20] sm:$0xff]  ;;  %vm520_vm8 = vcmask 589312   ;;  %vm527_vm9 = vcmask 654912   ;;  %vm534_vm10 = vcmask 720512  }
  0x2b   :  { %114 = vadd.xlane.f32.xlu0 %v113_v7  ;;  %v116_v11 = vadd.f32 %v52_v9, %v51_v8  ;;  %v54_v15 = vld [vmem:[#allocation2 + $0x28] sm:$0xff]  ;;  %v167_v16 = vadd.f32 %v86_v13, %v85_v12  ;;  %v87_v18 = vld [vmem:[#allocation2 + $0x130] sm:$0xff]  ;;  %v88_v19 = vld [vmem:[#allocation2 + $0x138] sm:$0xff]  ;;  %vm541_vm11 = vcmask 786112   ;;  %vm548_vm12 = vcmask 851712   ;;  %s945_s28 = smov [#allocation7]  }
  0x2c   :  { %v119_v17 = vadd.f32 %v54_v15, %v53_v14  ;;  %v55_v20 = vld [vmem:[#allocation2 + $0x30] sm:$0xff]  ;;  %v56_v21 = vld [vmem:[#allocation2 + $0x38] sm:$0xff]  ;;  %v170_v22 = vadd.f32 %v88_v19, %v87_v18  ;;  %v89_v24 = vld [vmem:[#allocation2 + $0x140] sm:$0xff]  ;;  %vm555_vm13 = vcmask 917312   ;;  %vm562_vm14 = vcmask 982912   ;;  %s749_s29 = sshll.u32 %s945_s28, 4  ;;  %s750_s29 = int_to_ptr.vmem [resolvable:$true] %s749_s29 }
  0x2d   :  { %v122_v23 = vadd.f32 %v56_v21, %v55_v20  ;;  %v90_v25 = vld [vmem:[#allocation2 + $0x148] sm:$0xff]  ;;  %v57_v26 = vld [vmem:[#allocation2 + $0x40] sm:$0xff]  ;;  %v91_v30 = vld [vmem:[#allocation2 + $0x150] sm:$0xff]  ;;  %vm569_vm15 = vcmask 1048512   ;;  %p913_p3 = scmp.lt.s32.totalorder %s750_s29, %s750_s29 }
  0x2e   :  { %165 = vadd.xlane.f32.xlu1 %v164_v10  ;;  %v58_v27 = vld [vmem:[#allocation2 + $0x48] sm:$0xff]  ;;  %v173_v28 = vadd.f32 %v90_v25, %v89_v24  ;;  %v92_v31 = vld [vmem:[#allocation2 + $0x158] sm:$0xff]  ;;  %v59_v32 = vld [vmem:[#allocation2 + $0x50] sm:$0xff] }
  0x2f   :  { %117 = vadd.xlane.f32.xlu0 %v116_v11  ;;  %v125_v29 = vadd.f32 %v58_v27, %v57_v26  ;;  %v60_v33 = vld [vmem:[#allocation2 + $0x58] sm:$0xff]  ;;  %v176_v34 = vadd.f32 %v92_v31, %v91_v30  ;;  %v93_v36 = vld [vmem:[#allocation2 + $0x160] sm:$0xff]  ;;  %v94_v37 = vld [vmem:[#allocation2 + $0x168] sm:$0xff] }
  0x30   :  { %v128_v35 = vadd.f32 %v60_v33, %v59_v32  ;;  %v61_v38 = vld [vmem:[#allocation2 + $0x60] sm:$0xff]  ;;  %v62_v39 = vld [vmem:[#allocation2 + $0x68] sm:$0xff]  ;;  %v179_v40 = vadd.f32 %v94_v37, %v93_v36  ;;  %v95_v42 = vld [vmem:[#allocation2 + $0x170] sm:$0xff] }
  0x31   :  { %v131_v41 = vadd.f32 %v62_v39, %v61_v38  ;;  %v96_v43 = vld [vmem:[#allocation2 + $0x178] sm:$0xff]  ;;  %v63_v44 = vld [vmem:[#allocation2 + $0x70] sm:$0xff]  ;;  %v97_v48 = vld [vmem:[#allocation2 + $0x180] sm:$0xff] }
  0x32   :  { %168 = vadd.xlane.f32.xlu1 %v167_v16  ;;  %v64_v45 = vld [vmem:[#allocation2 + $0x78] sm:$0xff]  ;;  %v182_v46 = vadd.f32 %v96_v43, %v95_v42  ;;  %v98_v49 = vld [vmem:[#allocation2 + $0x188] sm:$0xff]  ;;  %v65_v50 = vld [vmem:[#allocation2 + $0x80] sm:$0xff] }
  0x33   :  { %120 = vadd.xlane.f32.xlu0 %v119_v17  ;;  %v134_v47 = vadd.f32 %v64_v45, %v63_v44  ;;  %v66_v51 = vld [vmem:[#allocation2 + $0x88] sm:$0xff]  ;;  %v185_v52 = vadd.f32 %v98_v49, %v97_v48  ;;  %v99_v54 = vld [vmem:[#allocation2 + $0x190] sm:$0xff]  ;;  %v100_v55 = vld [vmem:[#allocation2 + $0x198] sm:$0xff] }
  0x34   :  { %v137_v53 = vadd.f32 %v66_v51, %v65_v50  ;;  %v67_v56 = vld [vmem:[#allocation2 + $0x90] sm:$0xff]  ;;  %v68_v57 = vld [vmem:[#allocation2 + $0x98] sm:$0xff]  ;;  %v188_v58 = vadd.f32 %v100_v55, %v99_v54  ;;  %v101_v59 = vld [vmem:[#allocation2 + $0x1a0] sm:$0xff] }
  0x35   :  { %v102_v60 = vld [vmem:[#allocation2 + $0x1a8] sm:$0xff]  ;;  %v140_v61 = vadd.f32 %v68_v57, %v67_v56  ;;  %v69_v62 = vld [vmem:[#allocation2 + $0xa0] sm:$0xff]  ;;  %v103_v4 = vld [vmem:[#allocation2 + $0x1b0] sm:$0xff] }
  0x36   :  { %171 = vadd.xlane.f32.xlu1 %v170_v22  ;;  %v249_v63 = vld [vmem:[#allocation5 + $0x40] sm:$0xff]  ;;  %v250_v0 = vld [vmem:[#allocation5 + $0x48] sm:$0xff]  ;;  %v191_v5 = vadd.f32 %v102_v60, %v101_v59  ;;  %v104_v6 = vld [vmem:[#allocation2 + $0x1b8] sm:$0xff]  ;;  %v942_v60 = vmov 0.0|0.0  }
  0x37   :  { %123 = vadd.xlane.f32.xlu0 %v122_v23  ;;  %v70_v1 = vld [vmem:[#allocation2 + $0xa8] sm:$0xff]  ;;  %v241_v2 = vld [vmem:[#allocation5] sm:$0xff]  ;;  %v71_v7 = vld [vmem:[#allocation2 + $0xb0] sm:$0xff]  ;;  %v282_v9 = vadd.f32 %v250_v0, %v249_v63  ;;  %v194_v18 = vadd.f32 %v104_v6, %v103_v4  ;;  %826 = vmatprep.subr.bf16.mxu1 %v942_v60 }
  0x38   :  { %v242_v3 = vld [vmem:[#allocation5 + $0x8] sm:$0xff]  ;;  %v72_v8 = vld [vmem:[#allocation2 + $0xb8] sm:$0xff]  ;;  %v143_v10 = vadd.f32 %v70_v1, %v69_v62  ;;  %v251_v11 = vld [vmem:[#allocation5 + $0x50] sm:$0xff]  ;;  %823 = vmatprep.subr.bf16.mxu0 %v942_v60 }
  0x39   :  { %v273_v12 = vadd.f32 %v242_v3, %v241_v2  ;;  %v265_v13 = vld [vmem:[#allocation5 + $0xc0] sm:$0xff]  ;;  %v266_v14 = vld [vmem:[#allocation5 + $0xc8] sm:$0xff]  ;;  %v243_v15 = vld [vmem:[#allocation5 + $0x10] sm:$0xff]  ;;  %v283_v21 = vadd.f32 %v282_v9, %v251_v11  ;;  %v146_v23 = vadd.f32 %v72_v8, %v71_v7 }
  0x3a   :  { %174 = vadd.xlane.f32.xlu1 %v173_v28  ;;  %v257_v16 = vld [vmem:[#allocation5 + $0x80] sm:$0xff]  ;;  %v258_v17 = vld [vmem:[#allocation5 + $0x88] sm:$0xff]  ;;  %v300_v22 = vadd.f32 %v266_v14, %v265_v13  ;;  %v252_v25 = vld [vmem:[#allocation5 + $0x58] sm:$0xff] }
  0x3b   :  { %126 = vadd.xlane.f32.xlu0 %v125_v29  ;;  %v105_v19 = vld [vmem:[#allocation2 + $0x1c0] sm:$0xff]  ;;  %v106_v20 = vld [vmem:[#allocation2 + $0x1c8] sm:$0xff]  ;;  %v274_v26 = vadd.f32 %v273_v12, %v243_v15  ;;  %v267_v27 = vld [vmem:[#allocation5 + $0xd0] sm:$0xff]  ;;  %v291_v28 = vadd.f32 %v258_v17, %v257_v16 }
  0x3c   :  { %v73_v24 = vld [vmem:[#allocation2 + $0xc0] sm:$0xff]  ;;  %v74_v29 = vld [vmem:[#allocation2 + $0xc8] sm:$0xff]  ;;  %v244_v30 = vld [vmem:[#allocation5 + $0x18] sm:$0xff]  ;;  %v197_v32 = vadd.f32 %v106_v20, %v105_v19  ;;  %v301_v36 = vadd.f32 %v300_v22, %v267_v27 }
  0x3d   :  { %v259_v31 = vld [vmem:[#allocation5 + $0x90] sm:$0xff]  ;;  %v149_v37 = vadd.f32 %v74_v29, %v73_v24  ;;  %v253_v39 = vld [vmem:[#allocation5 + $0x60] sm:$0xff]  ;;  %v76_v43 = vld [vmem:[#allocation2 + $0xd8] sm:$0xff] }
  0x3e   :  { %177 = vadd.xlane.f32.xlu1 %v176_v34  ;;  %v107_v33 = vld [vmem:[#allocation2 + $0x1d0] sm:$0xff]  ;;  %v108_v34 = vld [vmem:[#allocation2 + $0x1d8] sm:$0xff]  ;;  %v292_v42 = vadd.f32 %v291_v28, %v259_v31  ;;  %v245_v44 = vld [vmem:[#allocation5 + $0x20] sm:$0xff] }
  0x3f   :  { %129 = vadd.xlane.f32.xlu0 %v128_v35  ;;  %v284_v35 = vadd.f32 %v283_v21, %v252_v25  ;;  %v75_v38 = vld [vmem:[#allocation2 + $0xd0] sm:$0xff]  ;;  %v260_v45 = vld [vmem:[#allocation5 + $0x98] sm:$0xff]  ;;  %v314_v48 = vld [vmem:[%s1228_s2 + $0x8] sm:$0xff] }
  0x40   :  { %v109_v49 = vld [vmem:[#allocation2 + $0x1e0] sm:$0xff]  ;;  %v110_v50 = vld [vmem:[#allocation2 + $0x1e8] sm:$0xff]  ;;  %v152_v54 = vadd.f32 %v76_v43, %v75_v38  ;;  %v293_v59 = vadd.f32 %v292_v42, %v260_v45  ;;  %v315_v0 = vld [vmem:[%s1228_s2 + $0x10] sm:$0xff] }
  0x41   :  { %v285_v51 = vadd.f32 %v284_v35, %v253_v39  ;;  %v77_v55 = vld [vmem:[#allocation2 + $0xe0] sm:$0xff]  ;;  %v254_v56 = vld [vmem:[#allocation5 + $0x68] sm:$0xff]  ;;  %v316_v1 = vld [vmem:[%s1228_s2 + $0x18] sm:$0xff]  ;;  %v203_v2 = vadd.f32 %v110_v50, %v109_v49 }
  0x42   :  { %180 = vadd.xlane.f32.xlu1 %v179_v40  ;;  %v275_v40 = vadd.f32 %v274_v26, %v244_v30  ;;  %v246_v62 = vld [vmem:[#allocation5 + $0x28] sm:$0xff]  ;;  %v261_v63 = vld [vmem:[#allocation5 + $0xa0] sm:$0xff]  ;;  %v111_v3 = vld [vmem:[#allocation2 + $0x1f0] sm:$0xff]  ;;  %v830_v7 = vpack.c.bf16 %v316_v1, %v315_v0 }
  0x43   :  { %132 = vadd.xlane.f32.xlu0 %v131_v41  ;;  %v268_v41 = vld [vmem:[#allocation5 + $0xd8] sm:$0xff]  ;;  %v79_v9 = vld [vmem:[#allocation2 + $0xf0] sm:$0xff]  ;;  %v270_v12 = vld [vmem:[#allocation5 + $0xe8] sm:$0xff]  ;;  %v294_v13 = vadd.f32 %v293_v59, %v261_v63 }
  0x44   :  { %v276_v57 = vadd.f32 %v275_v40, %v245_v44  ;;  %v112_v4 = vld [vmem:[#allocation2 + $0x1f8] sm:$0xff]  ;;  %v247_v15 = vld [vmem:[#allocation5 + $0x30] sm:$0xff]  ;;  %v262_v16 = vld [vmem:[#allocation5 + $0xa8] sm:$0xff] }
  0x45   :  { %v80_v14 = vld [vmem:[#allocation2 + $0xf8] sm:$0xff]  ;;  %v317_v17 = vld [vmem:[%s1228_s2 + $0x20] sm:$0xff]  ;;  %v206_v19 = vadd.f32 %v112_v4, %v111_v3  ;;  %v271_v26 = vld [vmem:[#allocation5 + $0xf0] sm:$0xff]  ;;  %v295_v27 = vadd.f32 %v294_v13, %v262_v16 }
  0x46   :  { %183 = vadd.xlane.f32.xlu1 %v182_v46  ;;  %v200_v46 = vadd.f32 %v108_v34, %v107_v33  ;;  %v277_v11 = vadd.f32 %v276_v57, %v246_v62  ;;  %v256_v24 = vld [vmem:[#allocation5 + $0x78] sm:$0xff]  ;;  %v263_v29 = vld [vmem:[#allocation5 + $0xb0] sm:$0xff]  ;;  %v321_v39 = vld [vmem:[%s1228_s2 + $0x40] sm:$0xff] }
  0x47   :  { %135 = vadd.xlane.f32.xlu0 %v134_v47  ;;  %v313_v47 = vld [vmem:[%s1228_s2] sm:$0xff]  ;;  %v248_v28 = vld [vmem:[#allocation5 + $0x38] sm:$0xff]  ;;  %v319_v30 = vld [vmem:[%s1228_s2 + $0x30] sm:$0xff] }
  0x48   :  { %v278_v25 = vadd.f32 %v277_v11, %v247_v15  ;;  %v320_v31 = vld [vmem:[%s1228_s2 + $0x38] sm:$0xff]  ;;  %v322_v40 = vld [vmem:[%s1228_s2 + $0x48] sm:$0xff]  ;;  %v323_v44 = vld [vmem:[%s1228_s2 + $0x50] sm:$0xff] }
  0x49   :  { %v836_v34 = vpack.c.bf16 %v320_v31, %v319_v30  ;;  %v264_v38 = vld [vmem:[#allocation5 + $0xb8] sm:$0xff]  ;;  %v839_v42 = vpack.c.bf16 %v322_v40, %v321_v39  ;;  %v327_v50 = vld [vmem:[%s1228_s2 + $0x70] sm:$0xff] }
  0x4a   :  { %186 = vadd.xlane.f32.xlu1 %v185_v52  ;;  %v302_v52 = vadd.f32 %v301_v36, %v268_v41  ;;  %v279_v35 = vadd.f32 %v278_v25, %v248_v28  ;;  %v272_v36 = vld [vmem:[#allocation5 + $0xf8] sm:$0xff] }
  0x4b   :  { %138 = vadd.xlane.f32.xlu0 %v137_v53  ;;  %v827_v53 = vpack.c.bf16 %v314_v48, %v313_v47  ;;  %v324_v45 = vld [vmem:[%s1228_s2 + $0x58] sm:$0xff]  ;;  %v325_v47 = vld [vmem:[%s1228_s2 + $0x60] sm:$0xff]  ;;  %v326_v48 = vld [vmem:[%s1228_s2 + $0x68] sm:$0xff] }
  0x4c   :  { %v845_v49 = vpack.c.bf16 %v326_v48, %v325_v47 }
  0x4d   :  { %828 = vmatpush3.bf16.msra.mxu1 %v827_v53  ;;  %v944_v53 = vmov 0.0  }
  0x4e   :  { %189 = vadd.xlane.f32.xlu1 %v188_v58  ;;  %v269_v58 = vld [vmem:[#allocation5 + $0xe0] sm:$0xff]  ;;  %829 = vmatprep.subr.bf16.mxu1 %v942_v60 }
  0x4f   :  { %141 = vadd.xlane.f32.xlu0 %v140_v61  ;;  %v78_v61 = vld [vmem:[#allocation2 + $0xe8] sm:$0xff]  ;;  %v303_v6 = vadd.f32 %v302_v52, %v269_v58  ;;  %820 = vmatprep.mubr.msk.f32.mxu1 %vm943_vm0, %v944_v53 }
  0x50   :  { %v155_v8 = vadd.f32 %v78_v61, %v77_v55  ;;  %785 = vmatprep.mubr.msk.f32.mxu0 %vm943_vm0, %v944_v53  ;;  %v330_v55 = vld [vmem:[%s1229_s3 + $0x8] sm:$0xff]  ;;  %vm357_vm0 = vcmask 1041409  }
  0x51   :  { %831 = vmatpush3.bf16.msra.mxu1 %v830_v7  ;;  %v304_v21 = vadd.f32 %v303_v6, %v270_v12  ;;  %v335_v7 = vlaneseq }
  0x52   :  { %192 = vadd.xlane.f32.xlu1 %v191_v5  ;;  %v286_v5 = vadd.f32 %v285_v51, %v254_v56  ;;  %832 = vmatprep.subr.bf16.mxu1 %v942_v60  ;;  %v328_v51 = vld [vmem:[%s1228_s2 + $0x78] sm:$0xff] }
  0x53   :  { %144 = vadd.xlane.f32.xlu0 %v143_v10  ;;  %v255_v10 = vld [vmem:[#allocation5 + $0x70] sm:$0xff]  ;;  %v305_v33 = vadd.f32 %v304_v21, %v271_v26  ;;  %v848_v52 = vpack.c.bf16 %v328_v51, %v327_v50  ;;  %v1073_v11 = vshrl.u32 %v335_v7, 7 }
  0x54   :  { %v287_v20 = vadd.f32 %v286_v5, %v255_v10  ;;  %v336_v10 = vand.u32 127, %v335_v7 }
  0x55   :  { %v306_v41 = vadd.f32 %v305_v33, %v272_v36 }
  0x56   :  { %195 = vadd.xlane.f32.xlu1 %v194_v18  ;;  %v318_v18 = vld [vmem:[%s1228_s2 + $0x28] sm:$0xff]  ;;  %v341_v12 = vadd.s32 4294967288, %v336_v10  ;;  %v473_v13 = vadd.s32 4294967280, %v336_v10  ;;  %v480_v15 = vadd.s32 4294967272, %v336_v10  ;;  %v487_v16 = vadd.s32 4294967264, %v336_v10 }
  0x57   :  { %147 = vadd.xlane.f32.xlu0 %v146_v23  ;;  %v833_v22 = vpack.c.bf16 %v318_v18, %v317_v17  ;;  %v158_v23 = vadd.f32 %v80_v14, %v79_v9  ;;  %v494_v18 = vadd.s32 4294967256, %v336_v10  ;;  %v1080_v21 = vsub.s32 %v336_v10, %v1073_v11 }
  0x58   :  { %v1083_v25 = vsub.s32 %v341_v12, %v1073_v11  ;;  %v1086_v26 = vsub.s32 %v473_v13, %v1073_v11  ;;  %v536_v28 = vadd.s32 4294967208, %v336_v10  ;;  %v1094_v30 = vsub.s32 %v487_v16, %v1073_v11 }
  0x59   :  { %834 = vmatpush3.bf16.msra.mxu1 %v833_v22  ;;  %v515_v22 = vadd.s32 4294967232, %v336_v10  ;;  %v1099_v33 = vsub.s32 %v494_v18, %v1073_v11  ;;  %v550_v36 = vadd.s32 4294967192, %v336_v10 }
  0x5a   :  { %198 = vadd.xlane.f32.xlu1 %v197_v32  ;;  %835 = vmatprep.subr.bf16.mxu1 %v942_v60  ;;  %v288_v32 = vadd.f32 %v287_v20, %v256_v24  ;;  %v508_v20 = vadd.s32 4294967240, %v336_v10  ;;  %v529_v24 = vadd.s32 4294967216, %v336_v10 }
  0x5b   :  { %150 = vadd.xlane.f32.xlu0 %v149_v37  ;;  %v296_v37 = vadd.f32 %v295_v27, %v263_v29  ;;  %v1091_v29 = vsub.s32 %v480_v15, %v1073_v11 }
  0x5c   :  { %v1114_v40 = vsub.s32 %v529_v24, %v1073_v11 }
  0x5d   :  { %837 = vmatpush3.bf16.msra.mxu1 %v836_v34  ;;  %v297_v43 = vadd.f32 %v296_v37, %v264_v38  ;;  %v1108_v38 = vsub.s32 %v515_v22, %v1073_v11 }
  0x5e   :  { %201 = vadd.xlane.f32.xlu1 %v200_v46  ;;  %838 = vmatprep.subr.bf16.mxu1 %v942_v60  ;;  %v842_v46 = vpack.c.bf16 %v324_v45, %v323_v44  ;;  %v1117_v44 = vsub.s32 %v536_v28, %v1073_v11  ;;  %v557_v45 = vadd.s32 4294967184, %v336_v10 }
  0x5f   :  { %153 = vadd.xlane.f32.xlu0 %v152_v54  ;;  %v329_v54 = vld [vmem:[%s1229_s3] sm:$0xff] }
  0x60   :  { %v824_v56 = vpack.c.bf16 %v330_v55, %v329_v54  ;;  %v1123_v54 = vsub.s32 %v550_v36, %v1073_v11 }
  0x61   :  { %840 = vmatpush3.bf16.msra.mxu1 %v839_v42 }
  0x62   :  { %204 = vadd.xlane.f32.xlu1 %v203_v2  ;;  %841 = vmatprep.subr.bf16.mxu1 %v942_v60 }
  0x63   :  { %156 = vadd.xlane.f32.xlu0 %v155_v8  ;;  %825 = vmatpush3.bf16.msra.mxu0 %v824_v56 }
  0x65   :  { %843 = vmatpush3.bf16.msra.mxu1 %v842_v46 }
  0x66   :  { %207 = vadd.xlane.f32.xlu1 %v206_v19  ;;  %844 = vmatprep.subr.bf16.mxu1 %v942_v60  ;;  %v501_v19 = vadd.s32 4294967248, %v336_v10 }
  0x67   :  { %159 = vadd.xlane.f32.xlu0 %v158_v23  ;;  %v522_v23 = vadd.s32 4294967224, %v336_v10 }
  0x68   :  { %v1102_v34 = vsub.s32 %v501_v19, %v1073_v11 }
  0x69   :  { %846 = vmatpush3.bf16.msra.mxu1 %v845_v49  ;;  %v1111_v39 = vsub.s32 %v522_v23, %v1073_v11 }
  0x6a   :  { %289 = vadd.xlane.f32.xlu1 %v288_v32  ;;  %847 = vmatprep.subr.bf16.mxu1 %v942_v60  ;;  %v543_v32 = vadd.s32 4294967200, %v336_v10 }
  0x6b   :  { %280 = vadd.xlane.f32.xlu0 %v279_v35  ;;  %v1105_v35 = vsub.s32 %v508_v20, %v1073_v11 }
  0x6c   :  { %v1120_v50 = vsub.s32 %v543_v32, %v1073_v11 }
  0x6d   :  { %849 = vmatpush3.bf16.msra.mxu1 %v848_v52 }
  0x6e   :  { %307 = vadd.xlane.f32.xlu1 %v306_v41 }
  0x6f   :  { %298 = vadd.xlane.f32.xlu0 %v297_v43 }
  0xb7   :  { %v163_v57 = vpop.xlane.xlu1 %162 }
  0xb8   :  { %v115_v58 = vpop.xlane.xlu0 %114  ;;  %v225_v46 = vmul.f32 0.00390625, %v163_v57 }
  0xb9   :  { %v209_v51 = vmul.f32 0.00390625, %v115_v58  ;;  %v1130_v58 = vsub.s32 %v557_v45, %v1073_v11 }
  0xbb   :  { %v166_v59 = vpop.xlane.xlu1 %165 }
  0xbc   :  { %v118_v60 = vpop.xlane.xlu0 %117  ;;  %v226_v37 = vmul.f32 0.00390625, %v166_v59 }
  0xbd   :  { %v210_v41 = vmul.f32 0.00390625, %v118_v60  ;;  %v564_v60 = vadd.s32 4294967176, %v336_v10  ;;  %v467_v10 = vrot.slane %v209_v51, %v1080_v21 }
  0xbe   :  { %v578_v55 = vrot.slane %v226_v37, %v1083_v25 }
  0xbf   :  { %v169_v61 = vpop.xlane.xlu1 %168  ;;  %v471_v57 = vrot.slane %v210_v41, %v1083_v25  ;;  %v1144_v19 = vsub.s32 %v564_v60, %v1073_v11 }
  0xc0   :  { %v121_v62 = vpop.xlane.xlu0 %120  ;;  %v227_v42 = vmul.f32 0.00390625, %v169_v61 }
  0xc1   :  { %v211_v47 = vmul.f32 0.00390625, %v121_v62 }
  0xc2   :  { %v583_v61 = vrot.slane %v227_v42, %v1086_v26 }
  0xc3   :  { %v172_v63 = vpop.xlane.xlu1 %171 }
  0xc4   :  { %v124_v0 = vpop.xlane.xlu0 %123  ;;  %v228_v48 = vmul.f32 0.00390625, %v172_v63 }
  0xc5   :  { %v212_v52 = vmul.f32 0.00390625, %v124_v0  ;;  %v574_v0 = vrot.slane %v225_v46, %v1080_v21 }
  0xc6   :  { %v588_v7 = vrot.slane %v228_v48, %v1091_v29 }
  0xc7   :  { %v175_v1 = vpop.xlane.xlu1 %174  ;;  %v484_v12 = vrot.slane %v212_v52, %v1091_v29  ;;  %v579_v15 = vsel %vm346_vm1, %v578_v55, %v574_v0 }
  0xc8   :  { %v127_v2 = vpop.xlane.xlu0 %126  ;;  %v229_v53 = vmul.f32 0.00390625, %v175_v1  ;;  %v477_v1 = vrot.slane %v211_v47, %v1086_v26  ;;  %v584_v20 = vsel %vm478_vm2, %v583_v61, %v579_v15 }
  0xc9   :  { %v213_v56 = vmul.f32 0.00390625, %v127_v2  ;;  %v589_v26 = vsel %vm485_vm3, %v588_v7, %v584_v20 }
  0xcb   :  { %v178_v3 = vpop.xlane.xlu1 %177  ;;  %v491_v16 = vrot.slane %v213_v56, %v1094_v30 }
  0xcc   :  { %v1063_v4 = vpop.xlane.xlu0 %129  ;;  %v230_v59 = vmul.f32 0.00390625, %v178_v3 }
  0xcd   :  { %v214_v62 = vmul.f32 0.00390625, %v1063_v4  ;;  %v593_v4 = vrot.slane %v229_v53, %v1094_v30 }
  0xce   :  { %v598_v18 = vrot.slane %v230_v59, %v1099_v33 }
  0xcf   :  { %v1065_v5 = vpop.xlane.xlu1 %180  ;;  %v498_v22 = vrot.slane %v214_v62, %v1099_v33  ;;  %v594_v32 = vsel %vm492_vm4, %v593_v4, %v589_v26 }
  0xd0   :  { %v1067_v6 = vpop.xlane.xlu0 %132  ;;  %v231_v2 = vmul.f32 0.00390625, %v1065_v5  ;;  %v472_v5 = vsel %vm346_vm1, %v471_v57, %v467_v10  ;;  %v599_v37 = vsel %vm499_vm5, %v598_v18, %v594_v32 }
  0xd1   :  { %v215_v13 = vmul.f32 0.00390625, %v1067_v6  ;;  %v479_v24 = vsel %vm478_vm2, %v477_v1, %v472_v5  ;;  %vm359_vm2 = vcmask 130048  }
  0xd2   :  { %v603_v28 = vrot.slane %v231_v2, %v1102_v34  ;;  %v486_v30 = vsel %vm485_vm3, %v484_v12, %v479_v24  ;;  %vm730_vm3 = vcmask 123904  }
  0xd3   :  { %v1069_v8 = vpop.xlane.xlu1 %183  ;;  %v505_v33 = vrot.slane %v215_v13, %v1102_v34  ;;  %v493_v36 = vsel %vm492_vm4, %v491_v16, %v486_v30 }
  0xd4   :  { %v1071_v9 = vpop.xlane.xlu0 %135  ;;  %v232_v23 = vmul.f32 0.00390625, %v1069_v8 }
  0xd5   :  { %v216_v29 = vmul.f32 0.00390625, %v1071_v9  ;;  %v500_v9 = vsel %vm499_vm5, %v498_v22, %v493_v36 }
  0xd6   :  { %v608_v45 = vrot.slane %v232_v23, %v1105_v35 }
  0xd7   :  { %v1075_v14 = vpop.xlane.xlu1 %186  ;;  %v512_v48 = vrot.slane %v216_v29, %v1105_v35 }
  0xd8   :  { %v1077_v17 = vpop.xlane.xlu0 %138  ;;  %v233_v8 = vmul.f32 0.00390625, %v1075_v14  ;;  %v604_v14 = vsel %vm506_vm6, %v603_v28, %v599_v37 }
  0xd9   :  { %v217_v41 = vmul.f32 0.00390625, %v1077_v17  ;;  %v507_v17 = vsel %vm506_vm6, %v505_v33, %v500_v9  ;;  %v609_v57 = vsel %vm513_vm7, %v608_v45, %v604_v14 }
  0xdb   :  { %v1088_v27 = vpop.xlane.xlu1 %189  ;;  %v519_v59 = vrot.slane %v217_v41, %v1108_v38 }
  0xdc   :  { %v1096_v31 = vpop.xlane.xlu0 %141  ;;  %v234_v42 = vmul.f32 0.00390625, %v1088_v27  ;;  %v613_v27 = vrot.slane %v233_v8, %v1108_v38 }
  0xdd   :  { %v218_v46 = vmul.f32 0.00390625, %v1096_v31 }
  0xde   :  { %v618_v31 = vrot.slane %v234_v42, %v1111_v39  ;;  %v614_v2 = vsel %vm520_vm8, %v613_v27, %v609_v57 }
  0xdf   :  { %v193_v43 = vpop.xlane.xlu1 %192  ;;  %v526_v35 = vrot.slane %v218_v46, %v1111_v39 }
  0xe0   :  { %v145_v49 = vpop.xlane.xlu0 %144  ;;  %v235_v47 = vmul.f32 0.00390625, %v193_v43  ;;  %v619_v4 = vsel %vm527_vm9, %v618_v31, %v614_v2  ;;  %v760_v31 = vld [vmem:[%s1230_s4] ss:$0 sm:$0xff]  ;;  %s908_s4 = scalar_lea.vmem %s750_s29, 32 }
  0xe1   :  { %v219_v51 = vmul.f32 0.00390625, %v145_v49  ;;  %p909_p2 = scmp.ne.s32.totalorder %s750_s29, %s908_s4  ;;  %p914_p4 = scmp.lt.s32.totalorder %s908_s4, %s908_s4 }
  0xe2   :  { %v623_v49 = vrot.slane %v235_v47, %v1114_v40 }
  0xe3   :  { %v196_v63 = vpop.xlane.xlu1 %195  ;;  %v533_v0 = vrot.slane %v219_v51, %v1114_v40  ;;  %p915_p5 = por %p914_p4, %p913_p3 }
  0xe4   :  { %v148_v3 = vpop.xlane.xlu0 %147  ;;  %v236_v52 = vmul.f32 0.00390625, %v196_v63  ;;  %v514_v63 = vsel %vm513_vm7, %v512_v48, %v507_v17  ;;  %v624_v16 = vsel %vm534_vm10, %v623_v49, %v619_v4 }
  0xe5   :  { %v220_v55 = vmul.f32 0.00390625, %v148_v3  ;;  %v521_v39 = vsel %vm520_vm8, %v519_v59, %v514_v63  ;;  %p916_p6 = pnand %p915_p5, %p909_p2 }
  0xe6   :  { %v628_v1 = vrot.slane %v236_v52, %v1117_v44  ;;  %v528_v40 = vsel %vm527_vm9, %v526_v35, %v521_v39 }
  0xe7   :  { %v199_v6 = vpop.xlane.xlu1 %198  ;;  %v540_v3 = vrot.slane %v220_v55, %v1117_v44  ;;  %v535_v20 = vsel %vm534_vm10, %v533_v0, %v528_v40 }
  0xe8   :  { %v151_v11 = vpop.xlane.xlu0 %150  ;;  %v237_v56 = vmul.f32 0.00390625, %v199_v6  ;;  %v629_v22 = vsel %vm541_vm11, %v628_v1, %v624_v16 }
  0xe9   :  { %v221_v43 = vmul.f32 0.00390625, %v151_v11 }
  0xea   :  { %v633_v10 = vrot.slane %v237_v56, %v1120_v50 }
  0xeb   :  { %v202_v34 = vpop.xlane.xlu1 %201  ;;  %v547_v13 = vrot.slane %v221_v43, %v1120_v50  ;;  %v542_v50 = vsel %vm541_vm11, %v540_v3, %v535_v20 }
  0xec   :  { %v154_v53 = vpop.xlane.xlu0 %153  ;;  %v238_v60 = vmul.f32 0.00390625, %v202_v34  ;;  %v634_v26 = vsel %vm548_vm12, %v633_v10, %v629_v22 }
  0xed   :  { %v222_v61 = vmul.f32 0.00390625, %v154_v53  ;;  %v549_v29 = vsel %vm548_vm12, %v547_v13, %v542_v50 }
  0xee   :  { %v638_v15 = vrot.slane %v238_v60, %v1123_v54 }
  0xef   :  { %v205_v62 = vpop.xlane.xlu1 %204  ;;  %v554_v18 = vrot.slane %v222_v61, %v1123_v54 }
  0xf0   :  { %v239_v7 = vmul.f32 0.00390625, %v205_v62  ;;  %v157_v38 = vpop.xlane.xlu0 %156  ;;  %v639_v54 = vsel %vm555_vm13, %v638_v15, %v634_v26 }
  0xf1   :  { %v223_v12 = vmul.f32 0.00390625, %v157_v38  ;;  %v556_v30 = vsel %vm555_vm13, %v554_v18, %v549_v29 }
  0xf2   :  { %v643_v5 = vrot.slane %v239_v7, %v1130_v58 }
  0xf3   :  { %v208_v44 = vpop.xlane.xlu1 %207  ;;  %v561_v23 = vrot.slane %v223_v12, %v1130_v58 }
  0xf4   :  { %v240_v6 = vmul.f32 0.00390625, %v208_v44  ;;  %v160_v24 = vpop.xlane.xlu0 %159  ;;  %v644_v58 = vsel %vm562_vm14, %v643_v5, %v639_v54 }
  0xf5   :  { %v224_v28 = vmul.f32 0.00390625, %v160_v24  ;;  %v563_v36 = vsel %vm562_vm14, %v561_v23, %v556_v30 }
  0xf6   :  { %v648_v11 = vrot.slane %v240_v6, %v1144_v19 }
  0xf7   :  { %v568_v32 = vrot.slane %v224_v28, %v1144_v19  ;;  %v290_v33 = vpop.xlane.xlu1 %289 }
  0xf8   :  { %v281_v8 = vpop.xlane.xlu0 %280  ;;  %v649_v37 = vsel %vm569_vm15, %v648_v11, %v644_v58  ;;  %v310_v41 = vmul.f32 0.0009765625, %v290_v33 }
  0xf9   :  { %v309_v42 = vmul.f32 0.0009765625, %v281_v8  ;;  %v570_v9 = vsel %vm569_vm15, %v568_v32, %v563_v36 }
  0xfa   :  { %v650_v45 = vsel %vm357_vm0, %v649_v37, %v570_v9  ;;  %v345_v14 = vrot.slane %v310_v41, %v1083_v25 }
  0xfb   :  { %821 = vmatmul.mubr.f32.vlgmr.msra.gmra.mrb[0].mxu1 %v650_v45  ;;  %v308_v46 = vpop.xlane.xlu1 %307  ;;  %v340_v19 = vrot.slane %v309_v42, %v1080_v21 }
  0xfc   :  { %v312_v47 = vmul.f32 0.0009765625, %v308_v46  ;;  %v299_v34 = vpop.xlane.xlu0 %298 }
  0xfd   :  { %v311_v48 = vmul.f32 0.0009765625, %v299_v34  ;;  %v347_v53 = vsel %vm346_vm1, %v345_v14, %v340_v19 }
  0xfe   :  { %v355_v51 = vrot.slane %v312_v47, %v1083_v25 }
  0xff   :  { %v351_v52 = vrot.slane %v311_v48, %v1080_v21 }
 0x101   :  { %v356_v17 = vsel %vm346_vm1, %v355_v51, %v351_v52 }
 0x102   :  { %v358_v27 = vsel %vm357_vm0, %v356_v17, %v347_v53 }
 0x103   :  { %786 = vmatmul.mubr.msk.f32.vlgmr.msra.gmra.mrb[0].mxu0 %vm359_vm2, %v358_v27 }
 0x1ce   :  { %v718_v55 = vpop.f32.mrb[0].mxu1 }
 0x1cf   :  { %v822_v56 = vpop.f32.mrb[1].mxu1 }
 0x1d6   :  { %v428_v59 = vpop.f32.mrb[0].mxu0 }
 0x1d7   :  { %v719_v43 = vadd.f32 %v718_v55, %v428_v59  ;;  %v787_v60 = vpop.f32.mrb[1].mxu0 }
 0x1d9   :  { %v729_v25 = vadd.f32 %v760_v31, %v719_v43 }
 0x1db   :  { %v731_v21 = vsel %vm730_vm3, %v729_v25, -inf }
 0x1dc   :  { %732 = vmax.xlane.f32.xlu0 %v731_v21 }
 0x269   :  { %v733_v57 = vpop.xlane.xlu0 %732 }
 0x26a   :  { %v734_v35 = vsub.f32 %v729_v25, %v733_v57 }
 0x26c   :  { %v735_v49 = vmul.f32 1.442695, %v734_v35 }
 0x26e   :  { %860 = vpow2.f32 %v735_v49 }
 0x278   :  { %v861_v61 = vpop.eup %860 }
 0x279   :  { %v737_v62 = vsel %vm730_vm3, %v861_v61, 0.0 }
 0x27a   :  { %738 = vadd.xlane.f32.xlu1 %v737_v62 }
 0x307   :  { %v739_v63 = vpop.xlane.xlu1 %738 }
 0x308   :  { %862 = vrcp.f32 %v739_v63 }
 0x312   :  { %v863_v0 = vpop.eup %862 }
 0x313   :  { %v741_v1 = vmul.f32 %v863_v0, %v861_v61 }
 0x315   :  { %742 = vst.msk [vmem:[#allocation7] sm:$0x3] %vm730_vm3, %v741_v1 }
 0x316   :  { %919 = shalt.err (!%p916_p6)
}
 0x317   :  { %s920_s7 = scalar_lea.hbm %s1231_s5, 32 }
 0x318   :  { %p921_p7 = scmp.ne.s32.totalorder %s1231_s5, %s920_s7  ;;  %p924_p8 = scmp.lt.u32.totalorder %s920_s7, %s1231_s5 }
 0x31a   :  { %p926_p9 = pnand %p924_p8, %p921_p7 }
 0x31c   :  { %929 = shalt.err (!%p926_p9)
}
 0x31d   :  { %752 = dma.vmem_to_hbm [thread:$0]  %s750_s29, 32, %s1231_s5, [#allocation4]  }
 0x31e   :  { %934 = dma.done.wait [#allocation4], 32  }
 0x31f   :  { %935 = vsyncadd [#allocation4], 4294967264 }
 0x320   :  { %756 = vsyncpa [#allocation3], 1 }
 0x321   :  { %757 = vsyncpa [#allocation6], 1 }
 0x322   :  { %758 = vsyncpa [#allocation4], 1 }

</bundles_post_ra>
